<compile_context>
chip_gen: v7x
topology: tpu7x:2x2x1
jax: 0.10.0
libtpu: 0.0.40
codegen_flags: <defaults>
</compile_context>

<pallas_src>
import jax
import jax.numpy as jnp
from jax.experimental import pallas as pl
from jax.experimental.pallas import tpu as pltpu
from typing import NamedTuple

_LANE = 128
_SUBLANE = 8


def _round_up(x, m):
    return ((x + m - 1) // m) * m


def _vmem_budget_bytes():
    """Conservative per-kernel VMEM budget derived from the actual chip."""
    try:
        cap = int(pltpu.get_tpu_info().vmem_capacity_bytes)
    except Exception:
        cap = 64 * 1024 * 1024  # assume v7x (smallest VMEM) if query fails
    return max(int(cap * 0.55), 24 * 1024 * 1024)


def _pick_lane_tile(dim, pref):
    """Lane-axis tile: multiple of 128, prefer 256 multiples (v6e/v7x MXU)."""
    d128 = _round_up(dim, _LANE)
    if d128 <= pref:
        return d128, d128                       # single tile covers whole dim
    tile = max(256, (pref // 256) * 256)
    while tile > 256 and _round_up(d128, tile) - d128 > tile // 2:
        tile //= 2                              # bound padding waste
    return tile, _round_up(d128, tile)


def _pick_tm(M, pref):
    """Sublane-axis tile: multiple of 8, bounded M-padding waste."""
    m8 = _round_up(M, _SUBLANE)
    if m8 <= pref:
        return m8, m8                           # whole-M tile, zero extra pad
    tm = pref
    while tm > 64 and _round_up(m8, tm) - m8 > tm // 2:
        tm //= 2
    return tm, _round_up(m8, tm)


# ---------------------------------------------------------------------------
# Kernels
# ---------------------------------------------------------------------------

def _linear_kernel_acc(x_ref, w_ref, b_ref, o_ref, acc_ref):
    """K-tiled step of out = x @ W_kn + b with a resident f32 accumulator.

    x_ref : (tm, tk)   activation tile (compute dtype, e.g. bf16)
    w_ref : (tk, tn)   weight tile, pre-transposed (K, N) layout
    b_ref : (1,  tn)   f32 bias tile, resident across the K loop
    o_ref : (tm, tn)   output tile
    acc_ref: (tm, tn)  f32 VMEM accumulator
    """
    k = pl.program_id(2)
    partial = jnp.dot(x_ref[...], w_ref[...], preferred_element_type=jnp.float32)

    @pl.when(k == 0)
    def _():
        acc_ref[...] = partial          # write, don't zero-init + accumulate

    @pl.when(k != 0)
    def _():
        acc_ref[...] = acc_ref[...] + partial

    @pl.when(k == pl.num_programs(2) - 1)
    def _():
        o_ref[...] = (acc_ref[...] + b_ref[...]).astype(o_ref.dtype)


def _linear_kernel_single(x_ref, w_ref, b_ref, o_ref):
    """Single-K-tile case: no scratch accumulator round-trip."""
    o_ref[...] = (
        jnp.dot(x_ref[...], w_ref[...], preferred_element_type=jnp.float32)
        + b_ref[...]
    ).astype(o_ref.dtype)


# ---------------------------------------------------------------------------
# Module-init-time preparation (pad / transpose / cast weight ONCE)
# ---------------------------------------------------------------------------

class LinearParams(NamedTuple):
    w_kn: jax.Array          # (K_pad, N_pad), compute dtype, pre-transposed
    b2d: jax.Array           # (1, N_pad), f32
    n: int
    k: int
    tn: int
    tk: int
    n_pad: int
    k_pad: int
    compute_dtype: jnp.dtype
    tm_pref: int
    vmem_budget: int


def prepare_linear(weight, bias, *, compute_dtype=jnp.bfloat16,
                   tm_pref=512, tn_pref=1024, tk_pref=512):
    """weight: (N, K) exactly as torch nn.Linear stores it; bias: (N,)."""
    N, K = weight.shape
    assert bias.shape == (N,)
    compute_dtype = jnp.dtype(compute_dtype)
    comp_isz = compute_dtype.itemsize
    out_isz = 4  # assume f32 output for the footprint bound
    budget = _vmem_budget_bytes()

    tk, K_pad = _pick_lane_tile(K, tk_pref)
    tn, N_pad = _pick_lane_tile(N, tn_pref)

    def footprint(tn_, tk_):
        # double-buffered x/w/out/bias tiles + one f32 accumulator (worst case tm)
        return (2 * (tm_pref * tk_ + tk_ * tn_) * comp_isz
                + 2 * tm_pref * tn_ * out_isz
                + 2 * tn_ * 4
                + tm_pref * tn_ * 4)

    cur_tn, cur_tk = tn_pref, tk_pref
    while footprint(tn, tk) > budget and (cur_tn > 256 or cur_tk > 256):
        if cur_tk >= cur_tn and cur_tk > 256:
            cur_tk //= 2
        else:
            cur_tn //= 2
        tk, K_pad = _pick_lane_tile(K, max(cur_tk, _LANE))
        tn, N_pad = _pick_lane_tile(N, max(cur_tn, _LANE))

    # One-time weight transform: (N, K) -> (K, N), pad, cast.  Static cost at
    # init; keeps the per-K-step MXU feed transpose-free.
    w_kn = jnp.transpose(weight)
    if (K_pad, N_pad) != (K, N):
        w_kn = jnp.pad(w_kn, ((0, K_pad - K), (0, N_pad - N)))
    w_kn = w_kn.astype(compute_dtype)

    b_p = bias if N_pad == N else jnp.pad(bias, (0, N_pad - N))
    b2d = b_p.reshape(1, N_pad).astype(jnp.float32)

    return LinearParams(w_kn=w_kn, b2d=b2d, n=N, k=K, tn=tn, tk=tk,
                        n_pad=N_pad, k_pad=K_pad, compute_dtype=compute_dtype,
                        tm_pref=tm_pref, vmem_budget=budget)


# ---------------------------------------------------------------------------
# Forward
# ---------------------------------------------------------------------------

def linear_forward(x, params: LinearParams, *, tm=None):
    """x: (M, K) -> (M, N).  Only x is padded / cast per call."""
    M, K = x.shape
    assert K == params.k
    N, N_pad, K_pad = params.n, params.n_pad, params.k_pad
    tn, tk = params.tn, params.tk
    out_dtype = x.dtype

    if tm is None:
        tm, M_pad = _pick_tm(M, params.tm_pref)
    else:
        tm = _round_up(tm, _SUBLANE)
        M_pad = _round_up(M, tm)

    x_p = x
    if (M_pad, K_pad) != (M, K):
        x_p = jnp.pad(x, ((0, M_pad - M), (0, K_pad - K)))
    x_p = x_p.astype(params.compute_dtype)

    gm, gn, gk = M_pad // tm, N_pad // tn, K_pad // tk

    # v7x has 2 TensorCores sharing 'parallel' grid axes: if the parallel grid
    # collapsed to a single tile, split N so both cores get work.
    if gm * gn == 1 and tn >= 256 and (tn // 2) % _LANE == 0:
        tn //= 2
        gn = N_pad // tn

    comp_isz = params.compute_dtype.itemsize
    out_isz = jnp.dtype(out_dtype).itemsize
    footprint = (2 * (tm * tk + tk * tn) * comp_isz
                 + 2 * tm * tn * out_isz + 2 * tn * 4
                 + (tm * tn * 4 if gk > 1 else 0))
    vmem_limit = int(min(params.vmem_budget,
                         max(2 * footprint, 32 * 1024 * 1024)))

    cost = pl.CostEstimate(
        flops=2 * M_pad * N_pad * K_pad,
        transcendentals=0,
        bytes_accessed=(M_pad * K_pad * comp_isz + K_pad * N_pad * comp_isz
                        + N_pad * 4 + M_pad * N_pad * out_isz),
    )

    if gk == 1:
        # Whole K fits in one tile: no accumulator scratch needed.
        grid = (gm, gn)
        kernel = _linear_kernel_single
        in_specs = [
            pl.BlockSpec((tm, K_pad), lambda i, j: (i, 0)),   # x
            pl.BlockSpec((K_pad, tn), lambda i, j: (0, j)),   # W^T (K, N)
            pl.BlockSpec((1, tn), lambda i, j: (0, j)),       # bias
        ]
        out_specs = pl.BlockSpec((tm, tn), lambda i, j: (i, j))
        scratch_shapes = []
        sem = ("parallel", "parallel")
    else:
        grid = (gm, gn, gk)
        kernel = _linear_kernel_acc
        in_specs = [
            pl.BlockSpec((tm, tk), lambda i, j, k: (i, k)),   # x
            pl.BlockSpec((tk, tn), lambda i, j, k: (k, j)),   # W^T (K, N)
            # TODO(synk): if a bundle/trace shows exposed DMA on the K stream,
            # add pipeline_mode=pl.Buffered(3) to the weight BlockSpec.
            pl.BlockSpec((1, tn), lambda i, j, k: (0, j)),    # bias, K-resident
        ]
        out_specs = pl.BlockSpec((tm, tn), lambda i, j, k: (i, j))
        scratch_shapes = [pltpu.VMEM((tm, tn), jnp.float32)]
        sem = ("parallel", "parallel", "arbitrary")

    out_p = pl.pallas_call(
        kernel,
        out_shape=jax.ShapeDtypeStruct((M_pad, N_pad), out_dtype),
        grid_spec=pltpu.PrefetchScalarGridSpec(
            num_scalar_prefetch=0,
            grid=grid,
            in_specs=in_specs,
            out_specs=out_specs,
            scratch_shapes=scratch_shapes,
        ),
        compiler_params=pltpu.CompilerParams(
            dimension_semantics=sem,
            vmem_limit_bytes=vmem_limit,
        ),
        cost_estimate=cost,
    )(x_p, params.w_kn, params.b2d)

    if (M_pad, N_pad) != (M, N):
        out_p = out_p[:M, :N]
    return out_p


def kaiming_normal(key, out_features, in_features):
    # torch.nn.init.kaiming_normal_ default: fan_in mode, gain = sqrt(2)
    std = jnp.sqrt(2.0 / in_features)
    return std * jax.random.normal(key, (out_features, in_features), jnp.float32)


if __name__ == "__main__":
    # Small shapes consistent with the module (batch=8, in=32, out=64).
    in_features = 32
    out_features = 64
    batch = 8

    key = jax.random.PRNGKey(0)
    k_x, k_w = jax.random.split(key)

    x = jax.random.normal(k_x, (batch, in_features), jnp.float32)
    weight = kaiming_normal(k_w, out_features, in_features)   # (N, K) torch layout
    bias = jnp.zeros((out_features,), jnp.float32)            # constant_(0)

    # One-time (module init) weight/bias preparation: transpose + pad + bf16.
    params = prepare_linear(weight, bias, compute_dtype=jnp.bfloat16)

    out = linear_forward(x, params)
    jax.block_until_ready(out)

    # Reference in f32 (torch math).  bf16 operands + f32 accumulation =>
    # loose tolerance by design; pass compute_dtype=jnp.float32 for exact mode.
    ref = x @ weight.T + bias
    assert out.shape == (batch, out_features)
    assert out.dtype == x.dtype
    assert jnp.allclose(out, ref, atol=5e-2, rtol=5e-2), float(
        jnp.max(jnp.abs(out - ref)))

    print("KERNEL_OK")
</pallas_src>

<mosaic_0001>
module attributes {stable_mosaic.version = 11 : i64} {
  func.func @_linear_kernel_single(%arg0: i32, %arg1: i32, %arg2: memref<8x128xbf16, #tpu.memory_space<vmem>>, %arg3: memref<128x128xbf16, #tpu.memory_space<vmem>>, %arg4: memref<1x128xf32, #tpu.memory_space<vmem>>, %arg5: memref<8x128xf32, #tpu.memory_space<vmem>>) attributes {dimension_semantics = [#tpu.dimension_semantics<parallel>, #tpu.dimension_semantics<parallel>], iteration_bounds = array<i64: 1, 1>, scalar_prefetch = 0 : i64, scratch_operands = 0 : i64, tpu.core_type = #tpu.core_type<tc>, window_params = [{transform_indices = @transform_0, window_bounds = array<i64: 8, 128>}, {transform_indices = @transform_1, window_bounds = array<i64: 128, 128>}, {transform_indices = @transform_2, window_bounds = array<i64: 1, 128>}, {transform_indices = @transform_3, window_bounds = array<i64: 8, 128>}]} {
    %c0 = arith.constant 0 : index
    %c0_0 = arith.constant 0 : index
    %0 = vector.load %arg2[%c0, %c0_0] : memref<8x128xbf16, #tpu.memory_space<vmem>>, vector<8x128xbf16>
    %c0_1 = arith.constant 0 : index
    %c0_2 = arith.constant 0 : index
    %1 = vector.load %arg3[%c0_1, %c0_2] : memref<128x128xbf16, #tpu.memory_space<vmem>>, vector<128x128xbf16>
    %cst = arith.constant dense<0.000000e+00> : vector<8x128xf32>
    %2 = tpu.matmul %0, %1, %cst {dimension_numbers = #tpu.dot_dimension_numbers<[1], [0], [0], [1], [0, 0, 1, 1], [], []>} : vector<8x128xbf16>, vector<128x128xbf16>, vector<8x128xf32> -> vector<8x128xf32>
    %c0_3 = arith.constant 0 : index
    %c0_4 = arith.constant 0 : index
    %3 = vector.load %arg4[%c0_3, %c0_4] : memref<1x128xf32, #tpu.memory_space<vmem>>, vector<1x128xf32>
    %4 = vector.broadcast %3 : vector<1x128xf32> to vector<8x128xf32>
    %5 = arith.addf %2, %4 : vector<8x128xf32>
    %c0_5 = arith.constant 0 : index
    %c0_6 = arith.constant 0 : index
    %6 = vector.load %arg5[%c0_5, %c0_6] : memref<8x128xf32, #tpu.memory_space<vmem>>, vector<8x128xf32>
    tpu.vector_store %arg5[%c0_5, %c0_6], %5 {strides = array<i32>} : memref<8x128xf32, #tpu.memory_space<vmem>>, vector<8x128xf32>,
    return
  }
  func.func @transform_0(%arg0: i32, %arg1: i32) -> (i32, i32) {
    %c0_i32 = arith.constant 0 : i32
    %c0_i32_0 = arith.constant 0 : i32
    return %arg0, %c0_i32 : i32, i32
  }
  func.func @transform_1(%arg0: i32, %arg1: i32) -> (i32, i32) {
    %c0_i32 = arith.constant 0 : i32
    %c0_i32_0 = arith.constant 0 : i32
    return %c0_i32, %arg1 : i32, i32
  }
  func.func @transform_2(%arg0: i32, %arg1: i32) -> (i32, i32) {
    %c0_i32 = arith.constant 0 : i32
    %c0_i32_0 = arith.constant 0 : i32
    return %c0_i32, %arg1 : i32, i32
  }
  func.func @transform_3(%arg0: i32, %arg1: i32) -> (i32, i32) {
    %c0_i32 = arith.constant 0 : i32
    return %arg0, %arg1 : i32, i32
  }
}

</mosaic_0001>

<bundles_post_ra>
// kernel: tpu_custom_call.1
= control target key start
LH: loop header
LB: loop body
LE: loop exit
PB: predicated region body
PF: predicated region fallthrough
CT: control target
= control target key end

     0   :  { %8 = vsyncpa [#allocation3], 0  ;;  %s369_s0 = inlined_call_operand.hbm [shape: bf16[8,128], index: 0, kind: input, shape index: {}]   ;;  %s370_s1 = inlined_call_operand.hbm [shape: bf16[128,128], index: 1, kind: input, shape index: {}]   ;;  %s371_s2 = inlined_call_operand.vmem [shape: f32[1,128], index: 2, kind: input, shape index: {}]   ;;  %s372_s3 = inlined_call_operand.hbm [shape: f32[8,128], index: 3, kind: output, shape index: {}]  }
   0x1   :  { %9 = vsyncpa [#allocation6], 0 }
   0x2   :  { %10 = vsyncpa [#allocation4], 0  ;;  %s296_s12 = smov [#allocation2]   ;;  %s297_s14 = smov [#allocation5]  }
   0x3   :  { %s17_s13 = sshll.u32 %s296_s12, 4  ;;  %s26_s15 = sshll.u32 %s297_s14, 4  ;;  %s18_s13 = int_to_ptr.vmem [resolvable:$true] %s17_s13  ;;  %s323_s15 = int_to_ptr.vmem [resolvable:$true] %s26_s15 }
   0x4   :  { %s224_s18 = scalar_lea.hbm %s369_s0, 64 }
   0x5   :  { %p225_p0 = scmp.ne.s32.totalorder %s369_s0, %s224_s18  ;;  %p228_p1 = scmp.lt.u32.totalorder %s224_s18, %s369_s0 }
   0x7   :  { %p230_p2 = pnand %p228_p1, %p225_p0 }
   0x9   :  { %233 = shalt.err (!%p230_p2)
}
   0xa   :  { %s234_s23 = scalar_lea.vmem %s18_s13, 64  ;;  %p239_p4 = scmp.lt.s32.totalorder %s18_s13, %s18_s13 }
   0xb   :  { %p235_p3 = scmp.ne.s32.totalorder %s18_s13, %s234_s23  ;;  %p240_p5 = scmp.lt.s32.totalorder %s234_s23, %s234_s23 }
   0xd   :  { %p241_p6 = por %p240_p5, %p239_p4 }
   0xf   :  { %p242_p7 = pnand %p241_p6, %p235_p3 }
  0x11   :  { %245 = shalt.err (!%p242_p7)
}
  0x12   :  { %20 = dma.hbm_to_vmem [thread:$0]  %s369_s0, 64, %s18_s13, [#allocation3]  }
  0x13   :  { %s246_s28 = scalar_lea.hbm %s370_s1, 1024 }
  0x14   :  { %p247_p8 = scmp.ne.s32.totalorder %s370_s1, %s246_s28  ;;  %p250_p9 = scmp.lt.u32.totalorder %s246_s28, %s370_s1 }
  0x16   :  { %p252_p10 = pnand %p250_p9, %p247_p8 }
  0x18   :  { %255 = shalt.err (!%p252_p10)
}
  0x19   :  { %s256_s6 = scalar_lea.vmem %s323_s15, 1024  ;;  %p261_p12 = scmp.lt.s32.totalorder %s323_s15, %s323_s15 }
  0x1a   :  { %p257_p11 = scmp.ne.s32.totalorder %s323_s15, %s256_s6  ;;  %p262_p13 = scmp.lt.s32.totalorder %s256_s6, %s256_s6 }
  0x1c   :  { %p263_p0 = por %p262_p13, %p261_p12 }
  0x1e   :  { %p264_p1 = pnand %p263_p0, %p257_p11 }
  0x20   :  { %267 = shalt.err (!%p264_p1)
}
  0x21   :  { %s298_s0 = smov 64   ;;  %s299_s7 = smov 4  }
  0x22   :  { %32 = dma.hbm_to_vmem [thread:$0]  %s370_s1, 1024, %s323_s15, [#allocation6], %s298_s0, %s298_s0, %s299_s7  }
  0x23   :  { %290 = dma.done.wait [#allocation3], 64  }
  0x24   :  { %291 = vsyncadd [#allocation3], 4294967232 }
  0x25   :  { %292 = dma.done.wait [#allocation6], 1024  }
  0x26   :  { %293 = vsyncadd [#allocation6], 4294966272  ;;  %v300_v0 = vmov 0.0   ;;  %vm301_vm0 = vmmov 0   ;;  %v216_v1 = vld [vmem:[#allocation5] sm:$0xff]   ;;  %v217_v2 = vld [vmem:[#allocation5 + $0x8] sm:$0xff]  }
  0x27   :  { %189 = vmatprep.subr.bf16.mxu0 %v300_v0  ;;  %205 = vmatprep.mubr.msk.bf16.mxu0 %vm301_vm0, %v300_v0  ;;  %v218_v3 = vld [vmem:[#allocation5 + $0x10] sm:$0xff]   ;;  %v219_v4 = vld [vmem:[#allocation5 + $0x18] sm:$0xff]   ;;  %v220_v5 = vld [vmem:[#allocation5 + $0x20] sm:$0xff]   ;;  %s302_s11 = smov [#allocation7]  }
  0x28   :  { %190 = vmatpush3.bf16.msra.mxu0 %v216_v1  ;;  %v221_v6 = vld [vmem:[#allocation5 + $0x28] sm:$0xff]   ;;  %v222_v7 = vld [vmem:[#allocation5 + $0x30] sm:$0xff]   ;;  %v223_v8 = vld [vmem:[#allocation5 + $0x38] sm:$0xff]   ;;  %s161_s12 = sshll.u32 %s302_s11, 4  ;;  %s162_s12 = int_to_ptr.vmem [resolvable:$true] %s161_s12 }
  0x29   :  { %191 = vmatprep.subr.bf16.mxu0 %v300_v0  ;;  %v42_v9 = vld [vmem:[#allocation2] sm:$0xf]  ;;  %s268_s13 = scalar_lea.vmem %s162_s12, 128  ;;  %p273_p3 = scmp.lt.s32.totalorder %s162_s12, %s162_s12 }
  0x2a   :  { %v171_v10 = vld [vmem:[%s371_s2] ss:$0 sm:$0xff]  ;;  %p269_p2 = scmp.ne.s32.totalorder %s162_s12, %s268_s13  ;;  %p274_p4 = scmp.lt.s32.totalorder %s268_s13, %s268_s13 }
  0x2c   :  { %192 = vmatpush3.bf16.msra.mxu0 %v217_v2  ;;  %p275_p5 = por %p274_p4, %p273_p3 }
  0x2d   :  { %193 = vmatprep.subr.bf16.mxu0 %v300_v0 }
  0x2e   :  { %p276_p6 = pnand %p275_p5, %p269_p2 }
  0x30   :  { %194 = vmatpush3.bf16.msra.mxu0 %v218_v3 }
  0x31   :  { %195 = vmatprep.subr.bf16.mxu0 %v300_v0 }
  0x34   :  { %196 = vmatpush3.bf16.msra.mxu0 %v219_v4 }
  0x35   :  { %197 = vmatprep.subr.bf16.mxu0 %v300_v0 }
  0x38   :  { %198 = vmatpush3.bf16.msra.mxu0 %v220_v5 }
  0x39   :  { %199 = vmatprep.subr.bf16.mxu0 %v300_v0 }
  0x3c   :  { %200 = vmatpush3.bf16.msra.mxu0 %v221_v6 }
  0x3d   :  { %201 = vmatprep.subr.bf16.mxu0 %v300_v0 }
  0x40   :  { %202 = vmatpush3.bf16.msra.mxu0 %v222_v7 }
  0x41   :  { %203 = vmatprep.subr.bf16.mxu0 %v300_v0 }
  0x44   :  { %204 = vmatpush3.bf16.msra.mxu0 %v223_v8 }
  0x47   :  { %206 = vmatmul.mubr.bf16.vlgmr.msra.gmra.mrb[0].mxu0 %v42_v9 }
 0x11a   :  { %v148_v11 = vpop.f32.mrb[0].mxu0 }
 0x11b   :  { %v149_v12 = vadd.f32 %v171_v10, %v148_v11  ;;  %v207_v13 = vpop.f32.mrb[1].mxu0 }
 0x11c   :  { %v151_v14 = vpop.f32.mrb[2].mxu0 }
 0x11d   :  { %154 = vst [vmem:[#allocation7] sm:$0xff] %v149_v12  ;;  %v208_v15 = vpop.f32.mrb[3].mxu0 }
 0x11e   :  { %279 = shalt.err (!%p276_p6)
}
 0x11f   :  { %s280_s2 = scalar_lea.hbm %s372_s3, 128 }
 0x120   :  { %p281_p7 = scmp.ne.s32.totalorder %s372_s3, %s280_s2  ;;  %p284_p8 = scmp.lt.u32.totalorder %s280_s2, %s372_s3 }
 0x122   :  { %p286_p9 = pnand %p284_p8, %p281_p7 }
 0x124   :  { %289 = shalt.err (!%p286_p9)
}
 0x125   :  { %164 = dma.vmem_to_hbm [thread:$0]  %s162_s12, 128, %s372_s3, [#allocation4]  }
 0x126   :  { %294 = dma.done.wait [#allocation4], 128  }
 0x127   :  { %295 = vsyncadd [#allocation4], 4294967168 }
 0x128   :  { %168 = vsyncpa [#allocation3], 1 }
 0x129   :  { %169 = vsyncpa [#allocation6], 1 }
 0x12a   :  { %170 = vsyncpa [#allocation4], 1 }

</bundles_post_ra>
